<compile_context>
chip_gen: v7x
topology: tpu7x:2x2x1
jax: 0.10.0
libtpu: 0.0.40
codegen_flags: <defaults>
</compile_context>

<pallas_src>
import math

import jax
import jax.numpy as jnp
from jax.experimental import pallas as pl
from jax.experimental.pallas import tpu as pltpu


# ----------------------------------------------------------------------------
# parameter construction (PyTorch-style Linear init, weights stored (d_in, d_out))
# ----------------------------------------------------------------------------
def _init_linear(key, d_in, d_out):
    k_w, k_b = jax.random.split(key)
    bound = 1.0 / math.sqrt(d_in)
    w = jax.random.uniform(k_w, (d_in, d_out), jnp.float32, -bound, bound)
    b = jax.random.uniform(k_b, (1, d_out), jnp.float32, -bound, bound)
    return w, b


def build_params(key, dim_state, actor_cfgs):
    keys = jax.random.split(key, 1 + len(actor_cfgs))
    gate_params = _init_linear(keys[0], dim_state, len(actor_cfgs))

    actor_params_list = []
    for k, cfg in zip(keys[1:], actor_cfgs):
        num_actions = cfg["num_actions"]
        dims = cfg["dims"]                      # (first_state_dim, *hidden)
        dim_action_embed = cfg["dim_action_embed"]
        dim_all_actions = dim_action_embed * len(num_actions)
        first_state_dim, *hidden = dims
        assert first_state_dim == dim_state
        mlp_dims = (first_state_dim + dim_all_actions, *hidden, int(sum(num_actions)))
        layer_keys = jax.random.split(k, len(mlp_dims) - 1)
        mlp = tuple(_init_linear(lk, d_in, d_out)
                    for lk, d_in, d_out in zip(layer_keys, mlp_dims[:-1], mlp_dims[1:]))
        actor_params_list.append({
            "num_actions": tuple(int(n) for n in num_actions),
            "dim_all_actions": dim_all_actions,
            "mlp": mlp,
        })
    return gate_params, actor_params_list


# ----------------------------------------------------------------------------
# pack per-actor params into stacked / block-diagonal weights for the fused kernel
# ----------------------------------------------------------------------------
def _block_diag(mats):
    rows = sum(m.shape[0] for m in mats)
    cols = sum(m.shape[1] for m in mats)
    out = jnp.zeros((rows, cols), mats[0].dtype)
    r = c = 0
    for m in mats:
        out = out.at[r:r + m.shape[0], c:c + m.shape[1]].set(m)
        r += m.shape[0]
        c += m.shape[1]
    return out


def pack_params(dim_state, gate_params, actor_params_list, out_lane_width=128):
    wg, bg = gate_params
    num_actors = wg.shape[1]
    num_layers = len(actor_params_list[0]["mlp"])
    assert all(len(p["mlp"]) == num_layers for p in actor_params_list), \
        "stacked-actor packing requires a uniform MLP depth across actors"

    packed_layers = []
    h1_total = 0
    for li in range(num_layers):
        ws = [p["mlp"][li][0] for p in actor_params_list]
        bs = [p["mlp"][li][1] for p in actor_params_list]
        if li == 0:
            # PastActionsNet(past_actions=None) output is identically zero, so
            # x @ W1 == state @ W1[:dim_state] -> drop the embed rows entirely.
            ws = [w[:dim_state] for w in ws]
            h1_total = int(sum(w.shape[1] for w in ws))
            # Fuse the gate head: gate logits ride in the last `num_actors`
            # lanes of the layer-0 matmul output.
            w_packed = jnp.concatenate(ws + [wg], axis=1)     # (dim_state, sum(H1)+A)
            b_packed = jnp.concatenate(bs + [bg], axis=1)
        else:
            w_packed = _block_diag(ws)                         # block-diagonal
            b_packed = jnp.concatenate(bs, axis=1)
        # bf16 weights (single MXU pass, half the DMA); biases stay f32 and are
        # added to the f32 accumulator.
        packed_layers.append((w_packed.astype(jnp.bfloat16),
                              b_packed.astype(jnp.float32)))

    # segment layout of the packed logits row (one segment per action set per actor)
    segments, actor_slices = [], []
    off = 0
    for p in actor_params_list:
        a_start = off
        for n in p["num_actions"]:
            segments.append((off, int(n)))
            off += int(n)
        actor_slices.append((a_start, off - a_start))
    total = off

    out_width = max(out_lane_width,
                    ((total + num_actors + out_lane_width - 1) // out_lane_width)
                    * out_lane_width)

    return {
        "mlp": tuple(packed_layers),
        "segments": tuple(segments),
        "actor_slices": tuple(actor_slices),
        "total_actions": total,
        "num_actors": int(num_actors),
        "h1_total": h1_total,
        "out_width": int(out_width),
        "dim_state": int(dim_state),
    }


# ----------------------------------------------------------------------------
# fused Pallas kernel: (gate + actor layer-0) matmul, stacked MLP, segmented softmax
# ----------------------------------------------------------------------------
def _recip(x):
    # EUP approximate reciprocal + one Newton step -> ~f32 accuracy, VALU-light.
    r = pl.reciprocal(x, approx=True)
    return r * (2.0 - x * r)


def _make_fused_kernel(num_layers, segments, h1_total, num_actors, total, out_w):
    segments = tuple((int(s), int(n)) for s, n in segments)

    def kernel(state_ref, *refs):
        layer_refs = refs[:2 * num_layers]
        out_ref = refs[2 * num_layers]

        x = state_ref[...]                                    # bf16 (tb, dim_state)

        # ---- layer 0: all actors + gate head in ONE matmul ----
        w0 = layer_refs[0][...]
        b0 = layer_refs[1][...]
        y0 = jnp.dot(x, w0, preferred_element_type=jnp.float32) + b0
        h = y0[:, :h1_total]                                  # actor hidden (f32)
        g = y0[:, h1_total:h1_total + num_actors]             # gate logits (f32)

        # gates = Softmax(gate logits)   (f32 math throughout)
        g = g - jnp.max(g, axis=-1, keepdims=True)
        eg = jnp.exp(g)
        gates = eg * _recip(jnp.sum(eg, axis=-1, keepdims=True))

        # ---- remaining stacked layers (block-diagonal weights) ----
        for li in range(1, num_layers):
            h = (h * jax.nn.sigmoid(h)).astype(jnp.bfloat16)  # SiLU, then bf16 feed
            w = layer_refs[2 * li][...]
            b = layer_refs[2 * li + 1][...]
            h = jnp.dot(h, w, preferred_element_type=jnp.float32) + b
        logits = h                                            # (tb, total), f32

        # ---- segmented softmax: masked max + masked sum (no segP matmul) ----
        lane = jax.lax.broadcasted_iota(jnp.int32, (1, total), 1)
        m_b = jnp.zeros_like(logits)
        for start, n in segments:                              # static unroll
            in_seg = (lane >= start) & (lane < start + n)
            seg_max = jnp.max(jnp.where(in_seg, logits, -1e30),
                              axis=-1, keepdims=True)
            m_b = m_b + jnp.where(in_seg, seg_max, 0.0)
        e = jnp.exp(logits - m_b)
        denom = jnp.zeros_like(logits)
        for start, n in segments:
            in_seg = (lane >= start) & (lane < start + n)
            seg_sum = jnp.sum(jnp.where(in_seg, e, 0.0), axis=-1, keepdims=True)
            denom = denom + jnp.where(in_seg, seg_sum, 0.0)
        probs = e * _recip(denom)

        # ---- ONE lane-dense store: [probs | gates | zeros] -> (tb, out_w) ----
        rows = probs.shape[0]
        pieces = [probs, gates]
        pad_w = out_w - total - num_actors
        if pad_w > 0:
            pieces.append(jnp.zeros((rows, pad_w), jnp.float32))
        out_ref[...] = jnp.concatenate(pieces, axis=-1).astype(out_ref.dtype)

    return kernel


# ----------------------------------------------------------------------------
# wrapper: single fused pallas_call, 1-D batch grid with VMEM-resident weights
# ----------------------------------------------------------------------------
def hierarchical_controller_forward(state, packed, *, batch_block=256):
    B, dim_state = state.shape
    assert dim_state == packed["dim_state"]
    num_layers = len(packed["mlp"])
    num_actors = packed["num_actors"]
    total = packed["total_actions"]
    out_w = packed["out_width"]

    # bf16 activations pack 16 rows per vreg -> pad batch to a multiple of 16
    batch_block = max(16, (batch_block // 16) * 16)
    bp16 = max(16, ((B + 15) // 16) * 16)
    tb = min(batch_block, bp16)
    bp = ((bp16 + tb - 1) // tb) * tb
    state_p = jnp.pad(state, ((0, bp - B), (0, 0))).astype(jnp.bfloat16)

    inputs = [state_p]
    in_specs = [pl.BlockSpec((tb, dim_state), lambda i: (i, 0))]
    for w, b in packed["mlp"]:
        inputs.extend([w, b])
        # weights / biases stay VMEM-resident across all batch blocks
        in_specs.append(pl.BlockSpec(w.shape, lambda i: (0, 0)))
        in_specs.append(pl.BlockSpec(b.shape, lambda i: (0, 0)))

    kernel = _make_fused_kernel(num_layers, packed["segments"], packed["h1_total"],
                                num_actors, total, out_w)
    out_p = pl.pallas_call(
        kernel,
        out_shape=jax.ShapeDtypeStruct((bp, out_w), jnp.float32),
        grid=(bp // tb,),
        in_specs=in_specs,
        out_specs=pl.BlockSpec((tb, out_w), lambda i: (i, 0)),
        compiler_params=pltpu.CompilerParams(
            dimension_semantics=("parallel",)),
    )(*inputs)

    gates = out_p[:B, total:total + num_actors]
    probs_full = out_p[:B, :total]
    actor_probs = tuple(probs_full[:, s:s + n] for s, n in packed["actor_slices"])
    return gates, actor_probs


# ----------------------------------------------------------------------------
# pure-JAX reference (uses the ORIGINAL f32 per-actor weights incl. zero embed concat)
# ----------------------------------------------------------------------------
def _ref_forward(state, gate_params, actor_params_list):
    w_g, b_g = gate_params
    gates = jax.nn.softmax(state @ w_g + b_g, axis=-1)
    probs_all = []
    for p in actor_params_list:
        x = jnp.concatenate(
            [state, jnp.zeros((state.shape[0], p["dim_all_actions"]), state.dtype)],
            axis=-1)
        h = x
        for li, (w, b) in enumerate(p["mlp"]):
            h = h @ w + b
            if li != len(p["mlp"]) - 1:
                h = jax.nn.silu(h)
        segs, start = [], 0
        for n in p["num_actions"]:
            segs.append(jax.nn.softmax(h[:, start:start + n], axis=-1))
            start += n
        probs_all.append(jnp.concatenate(segs, axis=-1))
    return gates, tuple(probs_all)


# ----------------------------------------------------------------------------
if __name__ == "__main__":
    B = 2
    DIM_STATE = 32
    actor_cfgs = [
        {"num_actions": (4, 6), "dims": (DIM_STATE, 64, 48), "dim_action_embed": 4},
        {"num_actions": (4, 6), "dims": (DIM_STATE, 64, 48), "dim_action_embed": 4},
        {"num_actions": (4, 6), "dims": (DIM_STATE, 64, 48), "dim_action_embed": 4},
    ]

    key = jax.random.PRNGKey(0)
    k_state, k_params = jax.random.split(key)
    state = jax.random.normal(k_state, (B, DIM_STATE), dtype=jnp.float32)
    gate_params, actor_params_list = build_params(k_params, DIM_STATE, actor_cfgs)
    packed = pack_params(DIM_STATE, gate_params, actor_params_list)

    gates, actor_probs = hierarchical_controller_forward(state, packed)
    gates = jax.block_until_ready(gates)
    actor_probs = jax.block_until_ready(actor_probs)

    # numerical sanity against the un-fused pure-JAX f32 reference
    # (kernel uses bf16 weights/activations on the MXU -> looser tolerance)
    ref_gates, ref_probs = _ref_forward(state, gate_params, actor_params_list)
    assert gates.shape == (B, len(actor_cfgs))
    assert jnp.allclose(gates, ref_gates, atol=3e-2)
    assert jnp.allclose(jnp.sum(gates, axis=-1), 1.0, atol=1e-4)
    for p, rp, cfg in zip(actor_probs, ref_probs, actor_cfgs):
        assert p.shape == (B, sum(cfg["num_actions"]))
        assert jnp.allclose(p, rp, atol=3e-2)
        assert jnp.allclose(jnp.sum(p, axis=-1), float(len(cfg["num_actions"])),
                            atol=1e-3)
    assert bool(jnp.all(jnp.isfinite(gates)))
    for p in actor_probs:
        assert bool(jnp.all(jnp.isfinite(p)))

    print("KERNEL_OK")
</pallas_src>

<mosaic_0001>
module attributes {stable_mosaic.version = 11 : i64} {
  func.func @kernel(%arg0: i32, %arg1: memref<16x32xbf16, #tpu.memory_space<vmem>>, %arg2: memref<32x195xbf16, #tpu.memory_space<vmem>>, %arg3: memref<1x195xf32, #tpu.memory_space<vmem>>, %arg4: memref<192x144xbf16, #tpu.memory_space<vmem>>, %arg5: memref<1x144xf32, #tpu.memory_space<vmem>>, %arg6: memref<144x30xbf16, #tpu.memory_space<vmem>>, %arg7: memref<1x30xf32, #tpu.memory_space<vmem>>, %arg8: memref<16x128xf32, #tpu.memory_space<vmem>>) attributes {dimension_semantics = [#tpu.dimension_semantics<parallel>], iteration_bounds = array<i64: 1>, scalar_prefetch = 0 : i64, scratch_operands = 0 : i64, tpu.core_type = #tpu.core_type<tc>, window_params = [{transform_indices = @transform_0, window_bounds = array<i64: 16, 32>}, {pipeline_mode = #tpu.pipeline_mode<synchronous>, transform_indices = @transform_1, window_bounds = array<i64: 32, 195>}, {pipeline_mode = #tpu.pipeline_mode<synchronous>, transform_indices = @transform_2, window_bounds = array<i64: 1, 195>}, {pipeline_mode = #tpu.pipeline_mode<synchronous>, transform_indices = @transform_3, window_bounds = array<i64: 192, 144>}, {pipeline_mode = #tpu.pipeline_mode<synchronous>, transform_indices = @transform_4, window_bounds = array<i64: 1, 144>}, {pipeline_mode = #tpu.pipeline_mode<synchronous>, transform_indices = @transform_5, window_bounds = array<i64: 144, 30>}, {pipeline_mode = #tpu.pipeline_mode<synchronous>, transform_indices = @transform_6, window_bounds = array<i64: 1, 30>}, {transform_indices = @transform_7, window_bounds = array<i64: 16, 128>}]} {
    %c0 = arith.constant 0 : index
    %c0_0 = arith.constant 0 : index
    %0 = vector.load %arg1[%c0, %c0_0] : memref<16x32xbf16, #tpu.memory_space<vmem>>, vector<16x32xbf16>
    %c0_1 = arith.constant 0 : index
    %c0_2 = arith.constant 0 : index
    %1 = vector.load %arg2[%c0_1, %c0_2] : memref<32x195xbf16, #tpu.memory_space<vmem>>, vector<32x195xbf16>
    %c0_3 = arith.constant 0 : index
    %c0_4 = arith.constant 0 : index
    %2 = vector.load %arg3[%c0_3, %c0_4] : memref<1x195xf32, #tpu.memory_space<vmem>>, vector<1x195xf32>
    %cst = arith.constant dense<0.000000e+00> : vector<16x195xf32>
    %3 = tpu.matmul %0, %1, %cst {dimension_numbers = #tpu.dot_dimension_numbers<[1], [0], [0], [1], [0, 0, 1, 1], [], []>} : vector<16x32xbf16>, vector<32x195xbf16>, vector<16x195xf32> -> vector<16x195xf32>
    %4 = vector.broadcast %2 : vector<1x195xf32> to vector<16x195xf32>
    %5 = arith.addf %3, %4 : vector<16x195xf32>
    %6 = vector.extract_strided_slice %5 {offsets = [0, 0], sizes = [16, 192], strides = [1, 1]} : vector<16x195xf32> to vector<16x192xf32>
    %7 = vector.extract_strided_slice %5 {offsets = [0, 192], sizes = [16, 3], strides = [1, 1]} : vector<16x195xf32> to vector<16x3xf32>
    %cst_5 = arith.constant dense<0xFF800000> : vector<16xf32>
    %8 = vector.multi_reduction <maximumf>, %7, %cst_5 [1] : vector<16x3xf32> to vector<16xf32>
    %9 = vector.shape_cast %8 : vector<16xf32> to vector<16x1xf32>
    %10 = vector.broadcast %9 : vector<16x1xf32> to vector<16x3xf32>
    %11 = arith.subf %7, %10 : vector<16x3xf32>
    %12 = math.exp %11 : vector<16x3xf32>
    %cst_6 = arith.constant dense<0.000000e+00> : vector<16xf32>
    %13 = vector.multi_reduction <add>, %12, %cst_6 [1] : vector<16x3xf32> to vector<16xf32>
    %14 = vector.shape_cast %13 : vector<16xf32> to vector<16x1xf32>
    %15 = tpu.reciprocal %14 {approx = true} : vector<16x1xf32> -> vector<16x1xf32>
    %16 = arith.mulf %14, %15 : vector<16x1xf32>
    %cst_7 = arith.constant 2.000000e+00 : f32
    %17 = vector.broadcast %cst_7 : f32 to vector<16x1xf32>
    %18 = arith.subf %17, %16 : vector<16x1xf32>
    %19 = arith.mulf %15, %18 : vector<16x1xf32>
    %20 = vector.broadcast %19 : vector<16x1xf32> to vector<16x3xf32>
    %21 = arith.mulf %12, %20 : vector<16x3xf32>
    %22 = arith.negf %6 : vector<16x192xf32>
    %23 = math.exp %22 : vector<16x192xf32>
    %cst_8 = arith.constant 1.000000e+00 : f32
    %24 = vector.broadcast %cst_8 : f32 to vector<16x192xf32>
    %25 = arith.addf %24, %23 : vector<16x192xf32>
    %26 = arith.divf %24, %25 : vector<16x192xf32>
    %27 = arith.mulf %6, %26 : vector<16x192xf32>
    %28 = arith.truncf %27 : vector<16x192xf32> to vector<16x192xbf16>
    %c0_9 = arith.constant 0 : index
    %c0_10 = arith.constant 0 : index
    %29 = vector.load %arg4[%c0_9, %c0_10] : memref<192x144xbf16, #tpu.memory_space<vmem>>, vector<192x144xbf16>
    %c0_11 = arith.constant 0 : index
    %c0_12 = arith.constant 0 : index
    %30 = vector.load %arg5[%c0_11, %c0_12] : memref<1x144xf32, #tpu.memory_space<vmem>>, vector<1x144xf32>
    %cst_13 = arith.constant dense<0.000000e+00> : vector<16x144xf32>
    %31 = tpu.matmul %28, %29, %cst_13 {dimension_numbers = #tpu.dot_dimension_numbers<[1], [0], [0], [1], [0, 0, 1, 1], [], []>} : vector<16x192xbf16>, vector<192x144xbf16>, vector<16x144xf32> -> vector<16x144xf32>
    %32 = vector.broadcast %30 : vector<1x144xf32> to vector<16x144xf32>
    %33 = arith.addf %31, %32 : vector<16x144xf32>
    %34 = arith.negf %33 : vector<16x144xf32>
    %35 = math.exp %34 : vector<16x144xf32>
    %cst_14 = arith.constant 1.000000e+00 : f32
    %36 = vector.broadcast %cst_14 : f32 to vector<16x144xf32>
    %37 = arith.addf %36, %35 : vector<16x144xf32>
    %38 = arith.divf %36, %37 : vector<16x144xf32>
    %39 = arith.mulf %33, %38 : vector<16x144xf32>
    %40 = arith.truncf %39 : vector<16x144xf32> to vector<16x144xbf16>
    %c0_15 = arith.constant 0 : index
    %c0_16 = arith.constant 0 : index
    %41 = vector.load %arg6[%c0_15, %c0_16] : memref<144x30xbf16, #tpu.memory_space<vmem>>, vector<144x30xbf16>
    %c0_17 = arith.constant 0 : index
    %c0_18 = arith.constant 0 : index
    %42 = vector.load %arg7[%c0_17, %c0_18] : memref<1x30xf32, #tpu.memory_space<vmem>>, vector<1x30xf32>
    %cst_19 = arith.constant dense<0.000000e+00> : vector<16x30xf32>
    %43 = tpu.matmul %40, %41, %cst_19 {dimension_numbers = #tpu.dot_dimension_numbers<[1], [0], [0], [1], [0, 0, 1, 1], [], []>} : vector<16x144xbf16>, vector<144x30xbf16>, vector<16x30xf32> -> vector<16x30xf32>
    %44 = vector.broadcast %42 : vector<1x30xf32> to vector<16x30xf32>
    %45 = arith.addf %43, %44 : vector<16x30xf32>
    %46 = tpu.iota {dimensions = array<i32: 1>} : vector<1x30xi32>
    %cst_20 = arith.constant 0.000000e+00 : f32
    %47 = vector.broadcast %cst_20 : f32 to vector<16x30xf32>
    %c0_i32 = arith.constant 0 : i32
    %48 = vector.broadcast %c0_i32 : i32 to vector<1x30xi32>
    %49 = arith.cmpi sge, %46, %48 : vector<1x30xi32>
    %c4_i32 = arith.constant 4 : i32
    %50 = vector.broadcast %c4_i32 : i32 to vector<1x30xi32>
    %51 = arith.cmpi slt, %46, %50 : vector<1x30xi32>
    %52 = arith.andi %49, %51 : vector<1x30xi1>
    %cst_21 = arith.constant -1.000000e+30 : f32
    %53 = vector.shape_cast %52 : vector<1x30xi1> to vector<1x30xi1>
    %54 = vector.broadcast %53 : vector<1x30xi1> to vector<16x30xi1>
    %55 = vector.broadcast %cst_21 : f32 to vector<16x30xf32>
    %56 = arith.select %54, %45, %55 : vector<16x30xi1>, vector<16x30xf32>
    %cst_22 = arith.constant dense<0xFF800000> : vector<16xf32>
    %57 = vector.multi_reduction <maximumf>, %56, %cst_22 [1] : vector<16x30xf32> to vector<16xf32>
    %58 = vector.shape_cast %57 : vector<16xf32> to vector<16x1xf32>
    %cst_23 = arith.constant 0.000000e+00 : f32
    %59 = vector.shape_cast %52 : vector<1x30xi1> to vector<1x30xi1>
    %60 = vector.broadcast %59 : vector<1x30xi1> to vector<16x30xi1>
    %61 = vector.shape_cast %58 : vector<16x1xf32> to vector<16x1xf32>
    %62 = vector.broadcast %61 : vector<16x1xf32> to vector<16x30xf32>
    %63 = vector.broadcast %cst_23 : f32 to vector<16x30xf32>
    %64 = arith.select %60, %62, %63 : vector<16x30xi1>, vector<16x30xf32>
    %65 = arith.addf %47, %64 : vector<16x30xf32>
    %c4_i32_24 = arith.constant 4 : i32
    %66 = vector.broadcast %c4_i32_24 : i32 to vector<1x30xi32>
    %67 = arith.cmpi sge, %46, %66 : vector<1x30xi32>
    %c10_i32 = arith.constant 10 : i32
    %68 = vector.broadcast %c10_i32 : i32 to vector<1x30xi32>
    %69 = arith.cmpi slt, %46, %68 : vector<1x30xi32>
    %70 = arith.andi %67, %69 : vector<1x30xi1>
    %cst_25 = arith.constant -1.000000e+30 : f32
    %71 = vector.shape_cast %70 : vector<1x30xi1> to vector<1x30xi1>
    %72 = vector.broadcast %71 : vector<1x30xi1> to vector<16x30xi1>
    %73 = vector.broadcast %cst_25 : f32 to vector<16x30xf32>
    %74 = arith.select %72, %45, %73 : vector<16x30xi1>, vector<16x30xf32>
    %cst_26 = arith.constant dense<0xFF800000> : vector<16xf32>
    %75 = vector.multi_reduction <maximumf>, %74, %cst_26 [1] : vector<16x30xf32> to vector<16xf32>
    %76 = vector.shape_cast %75 : vector<16xf32> to vector<16x1xf32>
    %cst_27 = arith.constant 0.000000e+00 : f32
    %77 = vector.shape_cast %70 : vector<1x30xi1> to vector<1x30xi1>
    %78 = vector.broadcast %77 : vector<1x30xi1> to vector<16x30xi1>
    %79 = vector.shape_cast %76 : vector<16x1xf32> to vector<16x1xf32>
    %80 = vector.broadcast %79 : vector<16x1xf32> to vector<16x30xf32>
    %81 = vector.broadcast %cst_27 : f32 to vector<16x30xf32>
    %82 = arith.select %78, %80, %81 : vector<16x30xi1>, vector<16x30xf32>
    %83 = arith.addf %65, %82 : vector<16x30xf32>
    %c10_i32_28 = arith.constant 10 : i32
    %84 = vector.broadcast %c10_i32_28 : i32 to vector<1x30xi32>
    %85 = arith.cmpi sge, %46, %84 : vector<1x30xi32>
    %c14_i32 = arith.constant 14 : i32
    %86 = vector.broadcast %c14_i32 : i32 to vector<1x30xi32>
    %87 = arith.cmpi slt, %46, %86 : vector<1x30xi32>
    %88 = arith.andi %85, %87 : vector<1x30xi1>
    %cst_29 = arith.constant -1.000000e+30 : f32
    %89 = vector.shape_cast %88 : vector<1x30xi1> to vector<1x30xi1>
    %90 = vector.broadcast %89 : vector<1x30xi1> to vector<16x30xi1>
    %91 = vector.broadcast %cst_29 : f32 to vector<16x30xf32>
    %92 = arith.select %90, %45, %91 : vector<16x30xi1>, vector<16x30xf32>
    %cst_30 = arith.constant dense<0xFF800000> : vector<16xf32>
    %93 = vector.multi_reduction <maximumf>, %92, %cst_30 [1] : vector<16x30xf32> to vector<16xf32>
    %94 = vector.shape_cast %93 : vector<16xf32> to vector<16x1xf32>
    %cst_31 = arith.constant 0.000000e+00 : f32
    %95 = vector.shape_cast %88 : vector<1x30xi1> to vector<1x30xi1>
    %96 = vector.broadcast %95 : vector<1x30xi1> to vector<16x30xi1>
    %97 = vector.shape_cast %94 : vector<16x1xf32> to vector<16x1xf32>
    %98 = vector.broadcast %97 : vector<16x1xf32> to vector<16x30xf32>
    %99 = vector.broadcast %cst_31 : f32 to vector<16x30xf32>
    %100 = arith.select %96, %98, %99 : vector<16x30xi1>, vector<16x30xf32>
    %101 = arith.addf %83, %100 : vector<16x30xf32>
    %c14_i32_32 = arith.constant 14 : i32
    %102 = vector.broadcast %c14_i32_32 : i32 to vector<1x30xi32>
    %103 = arith.cmpi sge, %46, %102 : vector<1x30xi32>
    %c20_i32 = arith.constant 20 : i32
    %104 = vector.broadcast %c20_i32 : i32 to vector<1x30xi32>
    %105 = arith.cmpi slt, %46, %104 : vector<1x30xi32>
    %106 = arith.andi %103, %105 : vector<1x30xi1>
    %cst_33 = arith.constant -1.000000e+30 : f32
    %107 = vector.shape_cast %106 : vector<1x30xi1> to vector<1x30xi1>
    %108 = vector.broadcast %107 : vector<1x30xi1> to vector<16x30xi1>
    %109 = vector.broadcast %cst_33 : f32 to vector<16x30xf32>
    %110 = arith.select %108, %45, %109 : vector<16x30xi1>, vector<16x30xf32>
    %cst_34 = arith.constant dense<0xFF800000> : vector<16xf32>
    %111 = vector.multi_reduction <maximumf>, %110, %cst_34 [1] : vector<16x30xf32> to vector<16xf32>
    %112 = vector.shape_cast %111 : vector<16xf32> to vector<16x1xf32>
    %cst_35 = arith.constant 0.000000e+00 : f32
    %113 = vector.shape_cast %106 : vector<1x30xi1> to vector<1x30xi1>
    %114 = vector.broadcast %113 : vector<1x30xi1> to vector<16x30xi1>
    %115 = vector.shape_cast %112 : vector<16x1xf32> to vector<16x1xf32>
    %116 = vector.broadcast %115 : vector<16x1xf32> to vector<16x30xf32>
    %117 = vector.broadcast %cst_35 : f32 to vector<16x30xf32>
    %118 = arith.select %114, %116, %117 : vector<16x30xi1>, vector<16x30xf32>
    %119 = arith.addf %101, %118 : vector<16x30xf32>
    %c20_i32_36 = arith.constant 20 : i32
    %120 = vector.broadcast %c20_i32_36 : i32 to vector<1x30xi32>
    %121 = arith.cmpi sge, %46, %120 : vector<1x30xi32>
    %c24_i32 = arith.constant 24 : i32
    %122 = vector.broadcast %c24_i32 : i32 to vector<1x30xi32>
    %123 = arith.cmpi slt, %46, %122 : vector<1x30xi32>
    %124 = arith.andi %121, %123 : vector<1x30xi1>
    %cst_37 = arith.constant -1.000000e+30 : f32
    %125 = vector.shape_cast %124 : vector<1x30xi1> to vector<1x30xi1>
    %126 = vector.broadcast %125 : vector<1x30xi1> to vector<16x30xi1>
    %127 = vector.broadcast %cst_37 : f32 to vector<16x30xf32>
    %128 = arith.select %126, %45, %127 : vector<16x30xi1>, vector<16x30xf32>
    %cst_38 = arith.constant dense<0xFF800000> : vector<16xf32>
    %129 = vector.multi_reduction <maximumf>, %128, %cst_38 [1] : vector<16x30xf32> to vector<16xf32>
    %130 = vector.shape_cast %129 : vector<16xf32> to vector<16x1xf32>
    %cst_39 = arith.constant 0.000000e+00 : f32
    %131 = vector.shape_cast %124 : vector<1x30xi1> to vector<1x30xi1>
    %132 = vector.broadcast %131 : vector<1x30xi1> to vector<16x30xi1>
    %133 = vector.shape_cast %130 : vector<16x1xf32> to vector<16x1xf32>
    %134 = vector.broadcast %133 : vector<16x1xf32> to vector<16x30xf32>
    %135 = vector.broadcast %cst_39 : f32 to vector<16x30xf32>
    %136 = arith.select %132, %134, %135 : vector<16x30xi1>, vector<16x30xf32>
    %137 = arith.addf %119, %136 : vector<16x30xf32>
    %c24_i32_40 = arith.constant 24 : i32
    %138 = vector.broadcast %c24_i32_40 : i32 to vector<1x30xi32>
    %139 = arith.cmpi sge, %46, %138 : vector<1x30xi32>
    %c30_i32 = arith.constant 30 : i32
    %140 = vector.broadcast %c30_i32 : i32 to vector<1x30xi32>
    %141 = arith.cmpi slt, %46, %140 : vector<1x30xi32>
    %142 = arith.andi %139, %141 : vector<1x30xi1>
    %cst_41 = arith.constant -1.000000e+30 : f32
    %143 = vector.shape_cast %142 : vector<1x30xi1> to vector<1x30xi1>
    %144 = vector.broadcast %143 : vector<1x30xi1> to vector<16x30xi1>
    %145 = vector.broadcast %cst_41 : f32 to vector<16x30xf32>
    %146 = arith.select %144, %45, %145 : vector<16x30xi1>, vector<16x30xf32>
    %cst_42 = arith.constant dense<0xFF800000> : vector<16xf32>
    %147 = vector.multi_reduction <maximumf>, %146, %cst_42 [1] : vector<16x30xf32> to vector<16xf32>
    %148 = vector.shape_cast %147 : vector<16xf32> to vector<16x1xf32>
    %cst_43 = arith.constant 0.000000e+00 : f32
    %149 = vector.shape_cast %142 : vector<1x30xi1> to vector<1x30xi1>
    %150 = vector.broadcast %149 : vector<1x30xi1> to vector<16x30xi1>
    %151 = vector.shape_cast %148 : vector<16x1xf32> to vector<16x1xf32>
    %152 = vector.broadcast %151 : vector<16x1xf32> to vector<16x30xf32>
    %153 = vector.broadcast %cst_43 : f32 to vector<16x30xf32>
    %154 = arith.select %150, %152, %153 : vector<16x30xi1>, vector<16x30xf32>
    %155 = arith.addf %137, %154 : vector<16x30xf32>
    %156 = arith.subf %45, %155 : vector<16x30xf32>
    %157 = math.exp %156 : vector<16x30xf32>
    %cst_44 = arith.constant 0.000000e+00 : f32
    %158 = vector.broadcast %cst_44 : f32 to vector<16x30xf32>
    %c0_i32_45 = arith.constant 0 : i32
    %159 = vector.broadcast %c0_i32_45 : i32 to vector<1x30xi32>
    %160 = arith.cmpi sge, %46, %159 : vector<1x30xi32>
    %c4_i32_46 = arith.constant 4 : i32
    %161 = vector.broadcast %c4_i32_46 : i32 to vector<1x30xi32>
    %162 = arith.cmpi slt, %46, %161 : vector<1x30xi32>
    %163 = arith.andi %160, %162 : vector<1x30xi1>
    %cst_47 = arith.constant 0.000000e+00 : f32
    %164 = vector.shape_cast %163 : vector<1x30xi1> to vector<1x30xi1>
    %165 = vector.broadcast %164 : vector<1x30xi1> to vector<16x30xi1>
    %166 = vector.broadcast %cst_47 : f32 to vector<16x30xf32>
    %167 = arith.select %165, %157, %166 : vector<16x30xi1>, vector<16x30xf32>
    %cst_48 = arith.constant dense<0.000000e+00> : vector<16xf32>
    %168 = vector.multi_reduction <add>, %167, %cst_48 [1] : vector<16x30xf32> to vector<16xf32>
    %169 = vector.shape_cast %168 : vector<16xf32> to vector<16x1xf32>
    %cst_49 = arith.constant 0.000000e+00 : f32
    %170 = vector.shape_cast %163 : vector<1x30xi1> to vector<1x30xi1>
    %171 = vector.broadcast %170 : vector<1x30xi1> to vector<16x30xi1>
    %172 = vector.shape_cast %169 : vector<16x1xf32> to vector<16x1xf32>
    %173 = vector.broadcast %172 : vector<16x1xf32> to vector<16x30xf32>
    %174 = vector.broadcast %cst_49 : f32 to vector<16x30xf32>
    %175 = arith.select %171, %173, %174 : vector<16x30xi1>, vector<16x30xf32>
    %176 = arith.addf %158, %175 : vector<16x30xf32>
    %c4_i32_50 = arith.constant 4 : i32
    %177 = vector.broadcast %c4_i32_50 : i32 to vector<1x30xi32>
    %178 = arith.cmpi sge, %46, %177 : vector<1x30xi32>
    %c10_i32_51 = arith.constant 10 : i32
    %179 = vector.broadcast %c10_i32_51 : i32 to vector<1x30xi32>
    %180 = arith.cmpi slt, %46, %179 : vector<1x30xi32>
    %181 = arith.andi %178, %180 : vector<1x30xi1>
    %cst_52 = arith.constant 0.000000e+00 : f32
    %182 = vector.shape_cast %181 : vector<1x30xi1> to vector<1x30xi1>
    %183 = vector.broadcast %182 : vector<1x30xi1> to vector<16x30xi1>
    %184 = vector.broadcast %cst_52 : f32 to vector<16x30xf32>
    %185 = arith.select %183, %157, %184 : vector<16x30xi1>, vector<16x30xf32>
    %cst_53 = arith.constant dense<0.000000e+00> : vector<16xf32>
    %186 = vector.multi_reduction <add>, %185, %cst_53 [1] : vector<16x30xf32> to vector<16xf32>
    %187 = vector.shape_cast %186 : vector<16xf32> to vector<16x1xf32>
    %cst_54 = arith.constant 0.000000e+00 : f32
    %188 = vector.shape_cast %181 : vector<1x30xi1> to vector<1x30xi1>
    %189 = vector.broadcast %188 : vector<1x30xi1> to vector<16x30xi1>
    %190 = vector.shape_cast %187 : vector<16x1xf32> to vector<16x1xf32>
    %191 = vector.broadcast %190 : vector<16x1xf32> to vector<16x30xf32>
    %192 = vector.broadcast %cst_54 : f32 to vector<16x30xf32>
    %193 = arith.select %189, %191, %192 : vector<16x30xi1>, vector<16x30xf32>
    %194 = arith.addf %176, %193 : vector<16x30xf32>
    %c10_i32_55 = arith.constant 10 : i32
    %195 = vector.broadcast %c10_i32_55 : i32 to vector<1x30xi32>
    %196 = arith.cmpi sge, %46, %195 : vector<1x30xi32>
    %c14_i32_56 = arith.constant 14 : i32
    %197 = vector.broadcast %c14_i32_56 : i32 to vector<1x30xi32>
    %198 = arith.cmpi slt, %46, %197 : vector<1x30xi32>
    %199 = arith.andi %196, %198 : vector<1x30xi1>
    %cst_57 = arith.constant 0.000000e+00 : f32
    %200 = vector.shape_cast %199 : vector<1x30xi1> to vector<1x30xi1>
    %201 = vector.broadcast %200 : vector<1x30xi1> to vector<16x30xi1>
    %202 = vector.broadcast %cst_57 : f32 to vector<16x30xf32>
    %203 = arith.select %201, %157, %202 : vector<16x30xi1>, vector<16x30xf32>
    %cst_58 = arith.constant dense<0.000000e+00> : vector<16xf32>
    %204 = vector.multi_reduction <add>, %203, %cst_58 [1] : vector<16x30xf32> to vector<16xf32>
    %205 = vector.shape_cast %204 : vector<16xf32> to vector<16x1xf32>
    %cst_59 = arith.constant 0.000000e+00 : f32
    %206 = vector.shape_cast %199 : vector<1x30xi1> to vector<1x30xi1>
    %207 = vector.broadcast %206 : vector<1x30xi1> to vector<16x30xi1>
    %208 = vector.shape_cast %205 : vector<16x1xf32> to vector<16x1xf32>
    %209 = vector.broadcast %208 : vector<16x1xf32> to vector<16x30xf32>
    %210 = vector.broadcast %cst_59 : f32 to vector<16x30xf32>
    %211 = arith.select %207, %209, %210 : vector<16x30xi1>, vector<16x30xf32>
    %212 = arith.addf %194, %211 : vector<16x30xf32>
    %c14_i32_60 = arith.constant 14 : i32
    %213 = vector.broadcast %c14_i32_60 : i32 to vector<1x30xi32>
    %214 = arith.cmpi sge, %46, %213 : vector<1x30xi32>
    %c20_i32_61 = arith.constant 20 : i32
    %215 = vector.broadcast %c20_i32_61 : i32 to vector<1x30xi32>
    %216 = arith.cmpi slt, %46, %215 : vector<1x30xi32>
    %217 = arith.andi %214, %216 : vector<1x30xi1>
    %cst_62 = arith.constant 0.000000e+00 : f32
    %218 = vector.shape_cast %217 : vector<1x30xi1> to vector<1x30xi1>
    %219 = vector.broadcast %218 : vector<1x30xi1> to vector<16x30xi1>
    %220 = vector.broadcast %cst_62 : f32 to vector<16x30xf32>
    %221 = arith.select %219, %157, %220 : vector<16x30xi1>, vector<16x30xf32>
    %cst_63 = arith.constant dense<0.000000e+00> : vector<16xf32>
    %222 = vector.multi_reduction <add>, %221, %cst_63 [1] : vector<16x30xf32> to vector<16xf32>
    %223 = vector.shape_cast %222 : vector<16xf32> to vector<16x1xf32>
    %cst_64 = arith.constant 0.000000e+00 : f32
    %224 = vector.shape_cast %217 : vector<1x30xi1> to vector<1x30xi1>
    %225 = vector.broadcast %224 : vector<1x30xi1> to vector<16x30xi1>
    %226 = vector.shape_cast %223 : vector<16x1xf32> to vector<16x1xf32>
    %227 = vector.broadcast %226 : vector<16x1xf32> to vector<16x30xf32>
    %228 = vector.broadcast %cst_64 : f32 to vector<16x30xf32>
    %229 = arith.select %225, %227, %228 : vector<16x30xi1>, vector<16x30xf32>
    %230 = arith.addf %212, %229 : vector<16x30xf32>
    %c20_i32_65 = arith.constant 20 : i32
    %231 = vector.broadcast %c20_i32_65 : i32 to vector<1x30xi32>
    %232 = arith.cmpi sge, %46, %231 : vector<1x30xi32>
    %c24_i32_66 = arith.constant 24 : i32
    %233 = vector.broadcast %c24_i32_66 : i32 to vector<1x30xi32>
    %234 = arith.cmpi slt, %46, %233 : vector<1x30xi32>
    %235 = arith.andi %232, %234 : vector<1x30xi1>
    %cst_67 = arith.constant 0.000000e+00 : f32
    %236 = vector.shape_cast %235 : vector<1x30xi1> to vector<1x30xi1>
    %237 = vector.broadcast %236 : vector<1x30xi1> to vector<16x30xi1>
    %238 = vector.broadcast %cst_67 : f32 to vector<16x30xf32>
    %239 = arith.select %237, %157, %238 : vector<16x30xi1>, vector<16x30xf32>
    %cst_68 = arith.constant dense<0.000000e+00> : vector<16xf32>
    %240 = vector.multi_reduction <add>, %239, %cst_68 [1] : vector<16x30xf32> to vector<16xf32>
    %241 = vector.shape_cast %240 : vector<16xf32> to vector<16x1xf32>
    %cst_69 = arith.constant 0.000000e+00 : f32
    %242 = vector.shape_cast %235 : vector<1x30xi1> to vector<1x30xi1>
    %243 = vector.broadcast %242 : vector<1x30xi1> to vector<16x30xi1>
    %244 = vector.shape_cast %241 : vector<16x1xf32> to vector<16x1xf32>
    %245 = vector.broadcast %244 : vector<16x1xf32> to vector<16x30xf32>
    %246 = vector.broadcast %cst_69 : f32 to vector<16x30xf32>
    %247 = arith.select %243, %245, %246 : vector<16x30xi1>, vector<16x30xf32>
    %248 = arith.addf %230, %247 : vector<16x30xf32>
    %c24_i32_70 = arith.constant 24 : i32
    %249 = vector.broadcast %c24_i32_70 : i32 to vector<1x30xi32>
    %250 = arith.cmpi sge, %46, %249 : vector<1x30xi32>
    %c30_i32_71 = arith.constant 30 : i32
    %251 = vector.broadcast %c30_i32_71 : i32 to vector<1x30xi32>
    %252 = arith.cmpi slt, %46, %251 : vector<1x30xi32>
    %253 = arith.andi %250, %252 : vector<1x30xi1>
    %cst_72 = arith.constant 0.000000e+00 : f32
    %254 = vector.shape_cast %253 : vector<1x30xi1> to vector<1x30xi1>
    %255 = vector.broadcast %254 : vector<1x30xi1> to vector<16x30xi1>
    %256 = vector.broadcast %cst_72 : f32 to vector<16x30xf32>
    %257 = arith.select %255, %157, %256 : vector<16x30xi1>, vector<16x30xf32>
    %cst_73 = arith.constant dense<0.000000e+00> : vector<16xf32>
    %258 = vector.multi_reduction <add>, %257, %cst_73 [1] : vector<16x30xf32> to vector<16xf32>
    %259 = vector.shape_cast %258 : vector<16xf32> to vector<16x1xf32>
    %cst_74 = arith.constant 0.000000e+00 : f32
    %260 = vector.shape_cast %253 : vector<1x30xi1> to vector<1x30xi1>
    %261 = vector.broadcast %260 : vector<1x30xi1> to vector<16x30xi1>
    %262 = vector.shape_cast %259 : vector<16x1xf32> to vector<16x1xf32>
    %263 = vector.broadcast %262 : vector<16x1xf32> to vector<16x30xf32>
    %264 = vector.broadcast %cst_74 : f32 to vector<16x30xf32>
    %265 = arith.select %261, %263, %264 : vector<16x30xi1>, vector<16x30xf32>
    %266 = arith.addf %248, %265 : vector<16x30xf32>
    %267 = tpu.reciprocal %266 {approx = true} : vector<16x30xf32> -> vector<16x30xf32>
    %268 = arith.mulf %266, %267 : vector<16x30xf32>
    %cst_75 = arith.constant 2.000000e+00 : f32
    %269 = vector.broadcast %cst_75 : f32 to vector<16x30xf32>
    %270 = arith.subf %269, %268 : vector<16x30xf32>
    %271 = arith.mulf %267, %270 : vector<16x30xf32>
    %272 = arith.mulf %157, %271 : vector<16x30xf32>
    %cst_76 = arith.constant 0.000000e+00 : f32
    %273 = vector.broadcast %cst_76 : f32 to vector<16x95xf32>
    %274 = tpu.concatenate %272, %21, %273 in 1 : vector<16x30xf32>, vector<16x3xf32>, vector<16x95xf32> -> vector<16x128xf32>
    %c0_77 = arith.constant 0 : index
    %c0_78 = arith.constant 0 : index
    %275 = vector.load %arg8[%c0_77, %c0_78] : memref<16x128xf32, #tpu.memory_space<vmem>>, vector<16x128xf32>
    tpu.vector_store %arg8[%c0_77, %c0_78], %274 {strides = array<i32>} : memref<16x128xf32, #tpu.memory_space<vmem>>, vector<16x128xf32>,
    return
  }
  func.func @transform_0(%arg0: i32) -> (i32, i32) {
    %c0_i32 = arith.constant 0 : i32
    %c0_i32_0 = arith.constant 0 : i32
    return %arg0, %c0_i32 : i32, i32
  }
  func.func @transform_1(%arg0: i32) -> (i32, i32) {
    %c0_i32 = arith.constant 0 : i32
    %c0_i32_0 = arith.constant 0 : i32
    %c0_i32_1 = arith.constant 0 : i32
    return %c0_i32, %c0_i32_0 : i32, i32
  }
  func.func @transform_2(%arg0: i32) -> (i32, i32) {
    %c0_i32 = arith.constant 0 : i32
    %c0_i32_0 = arith.constant 0 : i32
    %c0_i32_1 = arith.constant 0 : i32
    return %c0_i32, %c0_i32_0 : i32, i32
  }
  func.func @transform_3(%arg0: i32) -> (i32, i32) {
    %c0_i32 = arith.constant 0 : i32
    %c0_i32_0 = arith.constant 0 : i32
    %c0_i32_1 = arith.constant 0 : i32
    return %c0_i32, %c0_i32_0 : i32, i32
  }
  func.func @transform_4(%arg0: i32) -> (i32, i32) {
    %c0_i32 = arith.constant 0 : i32
    %c0_i32_0 = arith.constant 0 : i32
    %c0_i32_1 = arith.constant 0 : i32
    return %c0_i32, %c0_i32_0 : i32, i32
  }
  func.func @transform_5(%arg0: i32) -> (i32, i32) {
    %c0_i32 = arith.constant 0 : i32
    %c0_i32_0 = arith.constant 0 : i32
    %c0_i32_1 = arith.constant 0 : i32
    return %c0_i32, %c0_i32_0 : i32, i32
  }
  func.func @transform_6(%arg0: i32) -> (i32, i32) {
    %c0_i32 = arith.constant 0 : i32
    %c0_i32_0 = arith.constant 0 : i32
    %c0_i32_1 = arith.constant 0 : i32
    return %c0_i32, %c0_i32_0 : i32, i32
  }
  func.func @transform_7(%arg0: i32) -> (i32, i32) {
    %c0_i32 = arith.constant 0 : i32
    %c0_i32_0 = arith.constant 0 : i32
    return %arg0, %c0_i32 : i32, i32
  }
}

</mosaic_0001>

<bundles_post_ra>
// kernel: tpu_custom_call.1
= control target key start
LH: loop header
LB: loop body
LE: loop exit
PB: predicated region body
PF: predicated region fallthrough
CT: control target
= control target key end

     0   :  { %v947_v2 = vmov 0   ;;  %vm71_vm0 = vcmask 261120   ;;  %s1367_s0 = inlined_call_operand.vmem [shape: bf16[16,32], index: 0, kind: input, shape index: {}]   ;;  %s1368_s1 = inlined_call_operand.vmem [shape: bf16[32,195], index: 1, kind: input, shape index: {}]   ;;  %s1369_s2 = inlined_call_operand.vmem [shape: f32[1,195], index: 2, kind: input, shape index: {}]   ;;  %s1370_s3 = inlined_call_operand.vmem [shape: bf16[192,144], index: 3, kind: input, shape index: {}]   ;;  %s1371_s4 = inlined_call_operand.vmem [shape: f32[1,144], index: 4, kind: input, shape index: {}]   ;;  %s1372_s5 = inlined_call_operand.vmem [shape: bf16[144,30], index: 5, kind: input, shape index: {}]   ;;  %s1373_s6 = inlined_call_operand.vmem [shape: f32[1,30], index: 6, kind: input, shape index: {}]   ;;  %s1374_s7 = inlined_call_operand.hbm [shape: f32[16,128], index: 7, kind: output, shape index: {}]  }
   0x1   :  { %v823_v0 = vld [vmem:[%s1368_s1 + $0x4] ss:$8 sps:$4 sm:$0xff]   ;;  %v825_v1 = vld [vmem:[%s1368_s1] ss:$8 sps:$4 sm:$0xff]   ;;  %107 = vmatprep.mubr.bf16.mxu0 %v947_v2  ;;  %v826_v3 = vld [vmem:[%s1368_s1 + $0x14] ss:$8 sps:$4 sm:$0xff]  }
   0x2   :  { %75 = vmatprep.subr.bf16.mxu0 %v823_v0  ;;  %v828_v4 = vld [vmem:[%s1368_s1 + $0x10] ss:$8 sps:$4 sm:$0xff]   ;;  %v830_v5 = vld [vmem:[%s1370_s3 + $0x4] ss:$8 sps:$4 sm:$0xff]   ;;  %v832_v6 = vld [vmem:[%s1370_s3] ss:$8 sps:$4 sm:$0xff]  }
   0x3   :  { %76 = vmatpush1.bf16.msra.mxu0 %v825_v1  ;;  %v833_v7 = vld [vmem:[%s1370_s3 + $0x14] ss:$8 sps:$4 sm:$0xff]   ;;  %v829_v8 = vld [vmem:[%s1367_s0] sm:$0xff]   ;;  %346 = vmatprep.subr.bf16.mxu1 %v830_v5  ;;  %v835_v9 = vld [vmem:[%s1370_s3 + $0x10] ss:$8 sps:$4 sm:$0xff]  }
   0x4   :  { %77 = vmatprep.subr.bf16.mxu0 %v826_v3  ;;  %347 = vmatpush1.bf16.msra.mxu1 %v832_v6  ;;  %v836_v10 = vld [vmem:[%s1370_s3 + $0x24] ss:$8 sps:$4 sm:$0xff]   ;;  %v838_v11 = vld [vmem:[%s1370_s3 + $0x20] ss:$8 sps:$4 sm:$0xff]  }
   0x5   :  { %348 = vmatprep.subr.bf16.mxu1 %v833_v7 }
   0x7   :  { %78 = vmatpush1.bf16.msra.mxu0 %v828_v4 }
   0x8   :  { %502 = vmatprep.subr.bf16.mxu0 %v947_v2  ;;  %349 = vmatpush1.bf16.msra.mxu1 %v835_v9 }
   0x9   :  { %350 = vmatprep.subr.bf16.mxu1 %v836_v10 }
   0xa   :  { %772 = vmatmul.mubr.msk.bf16.vlgmr.msra.gmra.mrb[0].mxu0 %vm71_vm0, %v829_v8 }
   0xc   :  { %351 = vmatpush1.bf16.msra.mxu1 %v838_v11 }
   0xd   :  { %12 = vsyncpa [#allocation3], 0  ;;  %v839_v12 = vld [vmem:[%s1370_s3 + $0x34] ss:$8 sps:$4 sm:$0xff]   ;;  %v841_v13 = vld [vmem:[%s1370_s3 + $0x30] ss:$8 sps:$4 sm:$0xff]   ;;  %v36_v30 = vlaneseq }
   0xe   :  { %352 = vmatprep.subr.bf16.mxu1 %v839_v12  ;;  %v842_v14 = vld [vmem:[%s1370_s3 + $0x44] ss:$8 sps:$4 sm:$0xff]   ;;  %v844_v15 = vld [vmem:[%s1370_s3 + $0x40] ss:$8 sps:$4 sm:$0xff]   ;;  %v845_v16 = vld [vmem:[%s1370_s3 + $0x54] ss:$8 sps:$4 sm:$0xff]  }
   0xf   :  { %v847_v17 = vld [vmem:[%s1370_s3 + $0x50] ss:$8 sps:$4 sm:$0xff]   ;;  %v848_v18 = vld [vmem:[%s1370_s3 + $0x64] ss:$8 sps:$4 sm:$0xff]   ;;  %v850_v19 = vld [vmem:[%s1370_s3 + $0x60] ss:$8 sps:$4 sm:$0xff]  }
  0x10   :  { %353 = vmatpush1.bf16.msra.mxu1 %v841_v13  ;;  %v851_v20 = vld [vmem:[%s1370_s3 + $0x74] ss:$8 sps:$4 sm:$0xff]   ;;  %v853_v21 = vld [vmem:[%s1370_s3 + $0x70] ss:$8 sps:$4 sm:$0xff]   ;;  %v854_v22 = vld [vmem:[%s1370_s3 + $0x84] ss:$8 sps:$4 sm:$0xff]  }
  0x11   :  { %354 = vmatprep.subr.bf16.mxu1 %v842_v14  ;;  %v856_v23 = vld [vmem:[%s1370_s3 + $0x80] ss:$8 sps:$4 sm:$0xff]   ;;  %v857_v24 = vld [vmem:[%s1370_s3 + $0x94] ss:$8 sps:$4 sm:$0xff]   ;;  %v859_v25 = vld [vmem:[%s1370_s3 + $0x90] ss:$8 sps:$4 sm:$0xff]  }
  0x12   :  { %v860_v26 = vld [vmem:[%s1370_s3 + $0xa4] ss:$8 sps:$4 sm:$0xff]   ;;  %v862_v27 = vld [vmem:[%s1370_s3 + $0xa0] ss:$8 sps:$4 sm:$0xff]   ;;  %v863_v28 = vld [vmem:[%s1370_s3 + $0xb4] ss:$8 sps:$4 sm:$0xff]  }
  0x13   :  { %v865_v29 = vld [vmem:[%s1370_s3 + $0xb0] ss:$8 sps:$4 sm:$0xff]   ;;  %v1083_v31 = vshrl.u32 %v36_v30, 7  ;;  %v34_v33 = vld [vmem:[%s1369_s2] sm:$0x3]  ;;  %vm118_vm1 = vcmask 548352  }
  0x14   :  { %355 = vmatpush1.bf16.msra.mxu1 %v844_v15  ;;  %vm342_vm2 = vcmask 523264   ;;  %v866_v6 = vld [vmem:[%s1372_s5] sm:$0xff]   ;;  %v867_v7 = vld [vmem:[%s1372_s5 + $0x8] sm:$0xff]   ;;  %v868_v8 = vld [vmem:[%s1372_s5 + $0x10] sm:$0xff]   ;;  %s948_s25 = smov 64   ;;  %vm498_vm3 = vcmask 130048  }
  0x15   :  { %356 = vmatprep.subr.bf16.mxu1 %v845_v16  ;;  %v38_v32 = vsub.s32 0, %v1083_v31  ;;  %v42_v34 = vsub.s32 1, %v1083_v31  ;;  %503 = vmatpush1.bf16.msra.mxu0 %v866_v6  ;;  %v869_v9 = vld [vmem:[%s1372_s5 + $0x18] sm:$0xff]   ;;  %v870_v10 = vld [vmem:[%s1372_s5 + $0x20] sm:$0xff]   ;;  %v871_v11 = vld [vmem:[%s1372_s5 + $0x28] sm:$0xff]   ;;  %vm552_vm7 = vcmask 244736  }
  0x16   :  { %504 = vmatprep.subr.bf16.mxu0 %v947_v2  ;;  %v872_v12 = vld [vmem:[%s1372_s5 + $0x30] sm:$0xff]   ;;  %v873_v15 = vld [vmem:[%s1372_s5 + $0x38] sm:$0xff]   ;;  %s950_s28 = smov [#allocation2]  }
  0x17   :  { %v39_v35 = vrot.slane %v34_v33, %v38_v32  ;;  %v43_v36 = vrot.slane %v34_v33, %v42_v34  ;;  %s756_s29 = sshll.u32 %s950_s28, 4  ;;  %s757_s29 = int_to_ptr.vmem [resolvable:$true] %s756_s29 }
  0x18   :  { %357 = vmatpush1.bf16.msra.mxu1 %v847_v17  ;;  %s923_s30 = scalar_lea.vmem %s757_s29, 256  ;;  %p928_p1 = scmp.lt.s32.totalorder %s757_s29, %s757_s29 }
  0x19   :  { %358 = vmatprep.subr.bf16.mxu1 %v848_v18  ;;  %505 = vmatpush1.bf16.msra.mxu0 %v867_v7  ;;  %p924_p0 = scmp.ne.s32.totalorder %s757_s29, %s923_s30  ;;  %p929_p2 = scmp.lt.s32.totalorder %s923_s30, %s923_s30 }
  0x1a   :  { %506 = vmatprep.subr.bf16.mxu0 %v947_v2 }
  0x1b   :  { %p930_p3 = por %p929_p2, %p928_p1 }
  0x1c   :  { %359 = vmatpush1.bf16.msra.mxu1 %v850_v19  ;;  %v874_v19 = vld [vmem:[%s1372_s5 + $0x40] sm:$0xff]  }
  0x1d   :  { %360 = vmatprep.subr.bf16.mxu1 %v851_v20  ;;  %507 = vmatpush1.bf16.msra.mxu0 %v868_v8  ;;  %p931_p4 = pnand %p930_p3, %p924_p0 }
  0x1e   :  { %508 = vmatprep.subr.bf16.mxu0 %v947_v2 }
  0x20   :  { %361 = vmatpush1.bf16.msra.mxu1 %v853_v21 }
  0x21   :  { %362 = vmatprep.subr.bf16.mxu1 %v854_v22  ;;  %509 = vmatpush1.bf16.msra.mxu0 %v869_v9 }
  0x22   :  { %510 = vmatprep.subr.bf16.mxu0 %v947_v2 }
  0x24   :  { %363 = vmatpush1.bf16.msra.mxu1 %v856_v23 }
  0x25   :  { %364 = vmatprep.subr.bf16.mxu1 %v857_v24  ;;  %511 = vmatpush1.bf16.msra.mxu0 %v870_v10 }
  0x26   :  { %512 = vmatprep.subr.bf16.mxu0 %v947_v2 }
  0x28   :  { %365 = vmatpush1.bf16.msra.mxu1 %v859_v25 }
  0x29   :  { %366 = vmatprep.subr.bf16.mxu1 %v860_v26  ;;  %513 = vmatpush1.bf16.msra.mxu0 %v871_v11 }
  0x2a   :  { %514 = vmatprep.subr.bf16.mxu0 %v947_v2 }
  0x2c   :  { %367 = vmatpush1.bf16.msra.mxu1 %v862_v27 }
  0x2d   :  { %368 = vmatprep.subr.bf16.mxu1 %v863_v28  ;;  %515 = vmatpush1.bf16.msra.mxu0 %v872_v12 }
  0x2e   :  { %516 = vmatprep.subr.bf16.mxu0 %v947_v2 }
  0x30   :  { %369 = vmatpush1.bf16.msra.mxu1 %v865_v29 }
  0x31   :  { %517 = vmatpush1.bf16.msra.mxu0 %v873_v15 }
  0x32   :  { %518 = vmatprep.subr.bf16.mxu0 %v947_v2  ;;  %v210_v2 = vld [vmem:[%s1371_s4] sm:$0x3] }
  0x33   :  { %v215_v23 = vrot.slane %v210_v2, %v38_v32  ;;  %v219_v24 = vrot.slane %v210_v2, %v42_v34 }
  0x35   :  { %519 = vmatpush1.bf16.msra.mxu0 %v874_v19 }
  0xdd   :  { %v109_v37 = vpop.f32.mrb[0].mxu0 }
  0xde   :  { %v110_v38 = vadd.f32 %v109_v37, %v39_v35  ;;  %v111_v39 = vpop.f32.mrb[1].mxu0 }
  0xdf   :  { %v1094_v40 = vadd.f32 %v111_v39, %v43_v36  ;;  %v113_v41 = vpop.f32.mrb[2].mxu0 }
  0xe0   :  { %v773_v42 = vmul.f32 -1.442695, %v110_v38  ;;  %v114_v43 = vadd.f32 %v113_v41, %v39_v35  ;;  %v115_v44 = vpop.f32.mrb[3].mxu0 }
  0xe1   :  { %v774_v45 = vmul.f32 -1.442695, %v1094_v40  ;;  %v1097_v46 = vadd.f32 %v115_v44, %v43_v36  ;;  %v119_v47 = vsel %vm118_vm1, %v1094_v40, -inf }
  0xe2   :  { %875 = vpow2.f32 %v773_v42  ;;  %v775_v48 = vmul.f32 -1.442695, %v114_v43  ;;  %120 = vmax.xlane.f32.xlu0 %v119_v47 }
  0xe3   :  { %877 = vpow2.f32 %v774_v45  ;;  %v776_v49 = vmul.f32 -1.442695, %v1097_v46  ;;  %v122_v50 = vsel %vm118_vm1, %v1097_v46, -inf }
  0xe4   :  { %879 = vpow2.f32 %v775_v48 }
  0xe5   :  { %881 = vpow2.f32 %v776_v49 }
  0xe6   :  { %123 = vmax.xlane.f32.xlu0 %v122_v50 }
  0xec   :  { %v876_v51 = vpop.eup %875 }
  0xed   :  { %v878_v52 = vpop.eup %877  ;;  %v168_v53 = vadd.f32 1.0, %v876_v51 }
  0xee   :  { %v880_v54 = vpop.eup %879  ;;  %v169_v55 = vadd.f32 1.0, %v878_v52 }
  0xef   :  { %v882_v56 = vpop.eup %881  ;;  %883 = vrcp.f32 %v168_v53  ;;  %v170_v57 = vadd.f32 1.0, %v880_v54 }
  0xf0   :  { %885 = vrcp.f32 %v169_v55  ;;  %v171_v58 = vadd.f32 1.0, %v882_v56  ;;  %v1157_v56 = vand.u32 127, %v36_v30 }
  0xf1   :  { %887 = vrcp.f32 %v170_v57  ;;  %v806_v57 = vld [vmem:[%s1373_s6] ss:$0 sm:$0xff]  ;;  %s949_s6 = smov 94  }
  0xf2   :  { %889 = vrcp.f32 %v171_v58  ;;  %vm563_vm4 = vcmp.ge.s32.totalorder %v1157_v56, 4  ;;  %vm564_vm5 = vcmp.lt.s32.totalorder %v1157_v56, 10  ;;  %vm546_vm6 = vcmp.lt.s32.totalorder %v1157_v56, 4 }
  0xf3   :  { %vm1167_vm8 = vmand %vm563_vm4, %vm564_vm5  ;;  %vm631_vm9 = vcmp.ge.s32.totalorder %v1157_v56, 24  ;;  %vm632_vm10 = vcmp.lt.s32.totalorder %v1157_v56, 30  ;;  %vm580_vm11 = vcmp.ge.s32.totalorder %v1157_v56, 10  ;;  %vm581_vm12 = vcmp.lt.s32.totalorder %v1157_v56, 14 }
  0xf4   :  { %vm1187_vm13 = vmand %vm631_vm9, %vm632_vm10  ;;  %vm597_vm15 = vcmp.ge.s32.totalorder %v1157_v56, 14  ;;  %vm598_vm0 = vcmp.lt.s32.totalorder %v1157_v56, 20  ;;  %vm139_vm4 = vcmask 23552  }
  0xf5   :  { %vm1192_vm14 = vmand %vm580_vm11, %vm581_vm12 }
  0xf6   :  { %vm1206_vm1 = vmand %vm597_vm15, %vm598_vm0 }
  0xf9   :  { %v884_v59 = vpop.eup %883 }
  0xfa   :  { %v886_v60 = vpop.eup %885  ;;  %v180_v63 = vmul.f32 %v884_v59, %v110_v38 }
  0xfb   :  { %v888_v61 = vpop.eup %887  ;;  %v181_v1 = vmul.f32 %v886_v60, %v1094_v40 }
  0xfc   :  { %v890_v62 = vpop.eup %889  ;;  %v182_v0 = vmul.f32 %v888_v61, %v114_v43 }
  0xfd   :  { %v183_v3 = vmul.f32 %v890_v62, %v1097_v46 }
  0xfe   :  { %v184_v4 = vpack.c.bf16 %v182_v0, %v180_v63 }
  0xff   :  { %v185_v5 = vpack.c.bf16 %v183_v3, %v181_v1 }
 0x101   :  { %801 = vmatprep.mubr.msk.bf16.mxu1 %vm342_vm2, %v185_v5  ;;  %vm614_vm2 = vcmp.ge.s32.totalorder %v1157_v56, 20 }
 0x102   :  { %379 = vmatmul.mubr.bf16.vlgmr.msra.gmra.mrb[0].mxu1 %v184_v4 }
 0x16f   :  { %v121_v13 = vpop.xlane.xlu0 %120 }
 0x170   :  { %v125_v14 = vsub.f32 %v1094_v40, %v121_v13 }
 0x172   :  { %v127_v16 = vmul.f32 1.442695, %v125_v14 }
 0x173   :  { %v124_v17 = vpop.xlane.xlu0 %123 }
 0x174   :  { %891 = vpow2.f32 %v127_v16  ;;  %v126_v18 = vsub.f32 %v1097_v46, %v124_v17 }
 0x176   :  { %v129_v20 = vmul.f32 1.442695, %v126_v18 }
 0x178   :  { %893 = vpow2.f32 %v129_v20 }
 0x17e   :  { %v1143_v21 = vpop.eup %891 }
 0x17f   :  { %133 = vrot.lane.b32.xlu1 %v1143_v21, %s948_s25 }
 0x182   :  { %v1146_v22 = vpop.eup %893 }
 0x183   :  { %135 = vrot.lane.b32.xlu1 %v1146_v22, %s948_s25 }
 0x1d5   :  { %v380_v25 = vpop.f32.mrb[0].mxu1 }
 0x1d6   :  { %v381_v26 = vadd.f32 %v380_v25, %v215_v23  ;;  %v382_v27 = vpop.f32.mrb[1].mxu1 }
 0x1d7   :  { %v383_v28 = vadd.f32 %v382_v27, %v219_v24  ;;  %v384_v29 = vpop.f32.mrb[2].mxu1 }
 0x1d8   :  { %v802_v33 = vmul.f32 -1.442695, %v381_v26  ;;  %v385_v35 = vadd.f32 %v384_v29, %v215_v23  ;;  %v386_v36 = vpop.f32.mrb[3].mxu1 }
 0x1d9   :  { %v803_v37 = vmul.f32 -1.442695, %v383_v28  ;;  %v387_v38 = vadd.f32 %v386_v36, %v219_v24 }
 0x1da   :  { %895 = vpow2.f32 %v802_v33  ;;  %v804_v39 = vmul.f32 -1.442695, %v385_v35 }
 0x1db   :  { %897 = vpow2.f32 %v803_v37  ;;  %v805_v40 = vmul.f32 -1.442695, %v387_v38 }
 0x1dc   :  { %899 = vpow2.f32 %v804_v39 }
 0x1dd   :  { %901 = vpow2.f32 %v805_v40 }
 0x1e4   :  { %v896_v32 = vpop.eup %895 }
 0x1e5   :  { %v898_v41 = vpop.eup %897  ;;  %v401_v31 = vadd.f32 1.0, %v896_v32 }
 0x1e6   :  { %v900_v34 = vpop.eup %899  ;;  %v402_v42 = vadd.f32 1.0, %v898_v41 }
 0x1e7   :  { %v902_v43 = vpop.eup %901  ;;  %903 = vrcp.f32 %v401_v31  ;;  %v403_v44 = vadd.f32 1.0, %v900_v34 }
 0x1e8   :  { %905 = vrcp.f32 %v402_v42  ;;  %v404_v45 = vadd.f32 1.0, %v902_v43 }
 0x1e9   :  { %907 = vrcp.f32 %v403_v44 }
 0x1ea   :  { %909 = vrcp.f32 %v404_v45 }
 0x1f1   :  { %v904_v46 = vpop.eup %903  ;;  %v134_v3 = vpop.permute.xlu1 %133 }
 0x1f2   :  { %v906_v47 = vpop.eup %905  ;;  %v413_v50 = vmul.f32 %v904_v46, %v381_v26  ;;  %v140_v37 = vsel %vm139_vm4, %v134_v3, 0.0 }
 0x1f3   :  { %v908_v48 = vpop.eup %907  ;;  %v414_v52 = vmul.f32 %v906_v47, %v383_v28 }
 0x1f4   :  { %v910_v49 = vpop.eup %909  ;;  %v415_v51 = vmul.f32 %v908_v48, %v385_v35 }
 0x1f5   :  { %v416_v53 = vmul.f32 %v910_v49, %v387_v38  ;;  %v136_v14 = vpop.permute.xlu1 %135 }
 0x1f6   :  { %v417_v54 = vpack.c.bf16 %v415_v51, %v413_v50  ;;  %v143_v17 = vsel %vm139_vm4, %v136_v14, 0.0 }
 0x1f7   :  { %v418_v55 = vpack.c.bf16 %v416_v53, %v414_v52 }
 0x1f9   :  { %816 = vmatprep.mubr.msk.bf16.mxu0 %vm498_vm3, %v418_v55  ;;  %vm615_vm3 = vcmp.lt.s32.totalorder %v1157_v56, 24 }
 0x1fa   :  { %535 = vmatmul.mubr.bf16.vlgmr.msra.gmra.mrb[4].mxu0 %v417_v54  ;;  %vm1217_vm5 = vmand %vm614_vm2, %vm615_vm3 }
 0x2cd   :  { %v536_v58 = vpop.f32.mrb[4].mxu0 }
 0x2ce   :  { %v1165_v59 = vadd.f32 %v806_v57, %v536_v58  ;;  %v538_v60 = vpop.f32.mrb[5].mxu0 }
 0x2cf   :  { %v539_v61 = vpop.f32.mrb[6].mxu0 }
 0x2d0   :  { %v1173_v30 = vadd.f32 %v806_v57, %v539_v61  ;;  %v541_v63 = vpop.f32.mrb[7].mxu0  ;;  %v550_v0 = vsel %vm546_vm6, %v1165_v59, -1e+30  ;;  %v568_v5 = vsel %vm1167_vm8, %v1165_v59, -1e+30 }
 0x2d1   :  { %v553_v1 = vsel %vm552_vm7, %v550_v0, -inf  ;;  %v570_v10 = vsel %vm552_vm7, %v568_v5, -inf  ;;  %v585_v11 = vsel %vm1192_vm14, %v1165_v59, -1e+30  ;;  %v602_v16 = vsel %vm1206_vm1, %v1165_v59, -1e+30 }
 0x2d2   :  { %554 = vmax.xlane.f32.xlu0 %v553_v1  ;;  %v551_v4 = vsel %vm546_vm6, %v1173_v30, -1e+30  ;;  %v637_v9 = vsel %vm1187_vm13, %v1173_v30, -1e+30  ;;  %v587_v15 = vsel %vm552_vm7, %v585_v11, -inf  ;;  %v604_v19 = vsel %vm552_vm7, %v602_v16, -inf }
 0x2d3   :  { %v556_v7 = vsel %vm552_vm7, %v551_v4, -inf  ;;  %v641_v12 = vsel %vm552_vm7, %v637_v9, -inf  ;;  %v619_v20 = vsel %vm1217_vm5, %v1165_v59, -1e+30  ;;  %v569_v23 = vsel %vm1167_vm8, %v1173_v30, -1e+30 }
 0x2d4   :  { %557 = vmax.xlane.f32.xlu1 %v556_v7  ;;  %v621_v2 = vsel %vm552_vm7, %v619_v20, -inf  ;;  %v573_v24 = vsel %vm552_vm7, %v569_v23, -inf  ;;  %v586_v25 = vsel %vm1192_vm14, %v1173_v30, -1e+30  ;;  %v603_v27 = vsel %vm1206_vm1, %v1173_v30, -1e+30 }
 0x2d5   :  { %v590_v26 = vsel %vm552_vm7, %v586_v25, -inf  ;;  %v607_v28 = vsel %vm552_vm7, %v603_v27, -inf  ;;  %v620_v29 = vsel %vm1217_vm5, %v1173_v30, -1e+30  ;;  %v636_v35 = vsel %vm1187_vm13, %v1165_v59, -1e+30 }
 0x2d6   :  { %571 = vmax.xlane.f32.xlu0 %v570_v10  ;;  %v624_v33 = vsel %vm552_vm7, %v620_v29, -inf  ;;  %v638_v36 = vsel %vm552_vm7, %v636_v35, -inf }
 0x2d8   :  { %642 = vmax.xlane.f32.xlu1 %v641_v12 }
 0x2da   :  { %588 = vmax.xlane.f32.xlu0 %v587_v15 }
 0x2dc   :  { %144 = vadd.xlane.f32.xlu1 %v143_v17 }
 0x2de   :  { %605 = vmax.xlane.f32.xlu0 %v604_v19 }
 0x2e2   :  { %622 = vmax.xlane.f32.xlu0 %v621_v2 }
 0x2e6   :  { %574 = vmax.xlane.f32.xlu0 %v573_v24 }
 0x2ea   :  { %591 = vmax.xlane.f32.xlu0 %v590_v26 }
 0x2ee   :  { %608 = vmax.xlane.f32.xlu0 %v607_v28 }
 0x2f2   :  { %625 = vmax.xlane.f32.xlu0 %v624_v33 }
 0x2f6   :  { %639 = vmax.xlane.f32.xlu0 %v638_v36 }
 0x2fa   :  { %141 = vadd.xlane.f32.xlu0 %v140_v37 }
 0x35f   :  { %v555_v38 = vpop.xlane.xlu0 %554 }
 0x360   :  { %v559_v49 = vsel %vm546_vm6, %v555_v38, 0.0 }
 0x361   :  { %v558_v34 = vpop.xlane.xlu1 %557 }
 0x362   :  { %v560_v44 = vsel %vm546_vm6, %v558_v34, 0.0 }
 0x363   :  { %v572_v39 = vpop.xlane.xlu0 %571 }
 0x364   :  { %v576_v45 = vsel %vm1167_vm8, %v572_v39, 0.0 }
 0x365   :  { %v578_v52 = vadd.f32 %v576_v45, %v559_v49  ;;  %v643_v55 = vpop.xlane.xlu1 %642 }
 0x366   :  { %v645_v3 = vsel %vm1187_vm13, %v643_v55, 0.0 }
 0x367   :  { %v589_v40 = vpop.xlane.xlu0 %588 }
 0x368   :  { %v593_v50 = vsel %vm1192_vm14, %v589_v40, 0.0 }
 0x369   :  { %v595_v57 = vadd.f32 %v593_v50, %v578_v52  ;;  %v145_v28 = vpop.xlane.xlu1 %144 }
 0x36b   :  { %v606_v32 = vpop.xlane.xlu0 %605 }
 0x36c   :  { %v610_v54 = vsel %vm1206_vm1, %v606_v32, 0.0 }
 0x36d   :  { %v612_v0 = vadd.f32 %v610_v54, %v595_v57 }
 0x36f   :  { %v623_v41 = vpop.xlane.xlu0 %622 }
 0x370   :  { %v627_v61 = vsel %vm1217_vm5, %v623_v41, 0.0 }
 0x371   :  { %v629_v4 = vadd.f32 %v627_v61, %v612_v0 }
 0x373   :  { %v575_v31 = vpop.xlane.xlu0 %574 }
 0x374   :  { %v577_v43 = vsel %vm1167_vm8, %v575_v31, 0.0 }
 0x375   :  { %v579_v47 = vadd.f32 %v577_v43, %v560_v44 }
 0x377   :  { %v592_v42 = vpop.xlane.xlu0 %591 }
 0x378   :  { %v594_v46 = vsel %vm1192_vm14, %v592_v42, 0.0 }
 0x379   :  { %v596_v53 = vadd.f32 %v594_v46, %v579_v47 }
 0x37b   :  { %v609_v48 = vpop.xlane.xlu0 %608 }
 0x37c   :  { %v611_v51 = vsel %vm1206_vm1, %v609_v48, 0.0 }
 0x37d   :  { %v613_v58 = vadd.f32 %v611_v51, %v596_v53 }
 0x37f   :  { %v626_v60 = vpop.xlane.xlu0 %625 }
 0x380   :  { %v628_v63 = vsel %vm1217_vm5, %v626_v60, 0.0 }
 0x381   :  { %v630_v1 = vadd.f32 %v628_v63, %v613_v58 }
 0x383   :  { %v647_v5 = vadd.f32 %v645_v3, %v630_v1  ;;  %v640_v7 = vpop.xlane.xlu0 %639 }
 0x384   :  { %v644_v9 = vsel %vm1187_vm13, %v640_v7, 0.0 }
 0x385   :  { %v649_v10 = vsub.f32 %v1173_v30, %v647_v5  ;;  %v646_v11 = vadd.f32 %v644_v9, %v629_v4 }
 0x387   :  { %v652_v12 = vmul.f32 1.442695, %v649_v10  ;;  %v648_v14 = vsub.f32 %v1165_v59, %v646_v11  ;;  %v142_v40 = vpop.xlane.xlu0 %141 }
 0x389   :  { %911 = vpow2.f32 %v652_v12  ;;  %v650_v15 = vmul.f32 1.442695, %v648_v14 }
 0x38b   :  { %913 = vpow2.f32 %v650_v15 }
 0x38c   :  { %915 = vrcp.f32 %v145_v28 }
 0x38d   :  { %917 = vrcp.f32 %v142_v40 }
 0x393   :  { %v1273_v16 = vpop.eup %911 }
 0x394   :  { %v655_v17 = vsel %vm546_vm6, %v1273_v16, 0.0  ;;  %v667_v59 = vsel %vm1167_vm8, %v1273_v16, 0.0  ;;  %v679_v25 = vsel %vm1192_vm14, %v1273_v16, 0.0  ;;  %v691_v33 = vsel %vm1206_vm1, %v1273_v16, 0.0 }
 0x395   :  { %v1278_v19 = vpop.eup %913  ;;  %v659_v20 = vsel %vm552_vm7, %v655_v17, 0.0  ;;  %v671_v24 = vsel %vm552_vm7, %v667_v59, 0.0  ;;  %v683_v29 = vsel %vm552_vm7, %v679_v25, 0.0  ;;  %v695_v37 = vsel %vm552_vm7, %v691_v33, 0.0 }
 0x396   :  { %660 = vadd.xlane.f32.xlu1 %v659_v20  ;;  %v654_v30 = vsel %vm546_vm6, %v1278_v19, 0.0  ;;  %v666_v23 = vsel %vm1167_vm8, %v1278_v19, 0.0  ;;  %v678_v27 = vsel %vm1192_vm14, %v1278_v19, 0.0  ;;  %v690_v36 = vsel %vm1206_vm1, %v1278_v19, 0.0  ;;  %v916_v44 = vpop.eup %915 }
 0x397   :  { %v656_v2 = vsel %vm552_vm7, %v654_v30, 0.0  ;;  %v668_v26 = vsel %vm552_vm7, %v666_v23, 0.0  ;;  %v680_v35 = vsel %vm552_vm7, %v678_v27, 0.0  ;;  %v703_v38 = vsel %vm1217_vm5, %v1273_v16, 0.0  ;;  %v918_v47 = vpop.eup %917 }
 0x398   :  { %657 = vadd.xlane.f32.xlu0 %v656_v2  ;;  %v692_v39 = vsel %vm552_vm7, %v690_v36, 0.0  ;;  %v702_v32 = vsel %vm1217_vm5, %v1278_v19, 0.0  ;;  %v707_v41 = vsel %vm552_vm7, %v703_v38, 0.0  ;;  %v715_v31 = vsel %vm1187_vm13, %v1273_v16, 0.0 }
 0x399   :  { %v704_v34 = vsel %vm552_vm7, %v702_v32, 0.0  ;;  %v714_v42 = vsel %vm1187_vm13, %v1278_v19, 0.0  ;;  %v719_v43 = vsel %vm552_vm7, %v715_v31, 0.0  ;;  %v149_v46 = vmul.f32 %v916_v44, %v145_v28 }
 0x39a   :  { %672 = vadd.xlane.f32.xlu1 %v671_v24  ;;  %v716_v45 = vsel %vm552_vm7, %v714_v42, 0.0  ;;  %v148_v49 = vmul.f32 %v918_v47, %v142_v40 }
 0x39b   :  { %v151_v48 = vsub.f32 2.0, %v149_v46 }
 0x39c   :  { %669 = vadd.xlane.f32.xlu0 %v668_v26  ;;  %v150_v51 = vsub.f32 2.0, %v148_v49 }
 0x39d   :  { %v153_v50 = vmul.f32 %v916_v44, %v151_v48 }
 0x39e   :  { %684 = vadd.xlane.f32.xlu1 %v683_v29  ;;  %v152_v53 = vmul.f32 %v918_v47, %v150_v51 }
 0x39f   :  { %v155_v52 = vmul.f32 %v1146_v22, %v153_v50 }
 0x3a0   :  { %681 = vadd.xlane.f32.xlu0 %v680_v35  ;;  %v154_v54 = vmul.f32 %v1143_v21, %v152_v53 }
 0x3a2   :  { %696 = vadd.xlane.f32.xlu1 %v695_v37 }
 0x3a4   :  { %693 = vadd.xlane.f32.xlu0 %v692_v39 }
 0x3a6   :  { %708 = vadd.xlane.f32.xlu1 %v707_v41 }
 0x3a8   :  { %705 = vadd.xlane.f32.xlu0 %v704_v34 }
 0x3aa   :  { %720 = vadd.xlane.f32.xlu1 %v719_v43 }
 0x3ac   :  { %717 = vadd.xlane.f32.xlu0 %v716_v45 }
 0x3bb   :  { %740 = vrot.lane.b32.xlu1 %v155_v52, %s949_s6 }
 0x3c2   :  { %738 = vrot.lane.b32.xlu0 %v154_v54, %s949_s6 }
 0x423   :  { %v661_v55 = vpop.xlane.xlu1 %660 }
 0x424   :  { %v663_v3 = vsel %vm546_vm6, %v661_v55, 0.0 }
 0x425   :  { %v658_v57 = vpop.xlane.xlu0 %657 }
 0x426   :  { %v662_v7 = vsel %vm546_vm6, %v658_v57, 0.0  ;;  %vm746_vm6 = vcmask 269312  }
 0x427   :  { %v673_v58 = vpop.xlane.xlu1 %672 }
 0x428   :  { %v675_v0 = vsel %vm1167_vm8, %v673_v58, 0.0 }
 0x429   :  { %v670_v60 = vpop.xlane.xlu0 %669  ;;  %v677_v4 = vadd.f32 %v675_v0, %v663_v3 }
 0x42a   :  { %v674_v22 = vsel %vm1167_vm8, %v670_v60, 0.0 }
 0x42b   :  { %v685_v61 = vpop.xlane.xlu1 %684  ;;  %v676_v11 = vadd.f32 %v674_v22, %v662_v7 }
 0x42c   :  { %v687_v21 = vsel %vm1192_vm14, %v685_v61, 0.0 }
 0x42d   :  { %v682_v63 = vpop.xlane.xlu0 %681  ;;  %v689_v12 = vadd.f32 %v687_v21, %v677_v4 }
 0x42e   :  { %v686_v9 = vsel %vm1192_vm14, %v682_v63, 0.0 }
 0x42f   :  { %v697_v1 = vpop.xlane.xlu1 %696  ;;  %v688_v17 = vadd.f32 %v686_v9, %v676_v11 }
 0x430   :  { %v699_v10 = vsel %vm1206_vm1, %v697_v1, 0.0 }
 0x431   :  { %v694_v5 = vpop.xlane.xlu0 %693  ;;  %v701_v20 = vadd.f32 %v699_v10, %v689_v12 }
 0x432   :  { %v698_v62 = vsel %vm1206_vm1, %v694_v5, 0.0 }
 0x433   :  { %v709_v14 = vpop.xlane.xlu1 %708  ;;  %v700_v8 = vadd.f32 %v698_v62, %v688_v17 }
 0x434   :  { %v711_v15 = vsel %vm1217_vm5, %v709_v14, 0.0 }
 0x435   :  { %v706_v30 = vpop.xlane.xlu0 %705  ;;  %v713_v59 = vadd.f32 %v711_v15, %v701_v20 }
 0x436   :  { %v710_v56 = vsel %vm1217_vm5, %v706_v30, 0.0 }
 0x437   :  { %v721_v2 = vpop.xlane.xlu1 %720  ;;  %v712_v24 = vadd.f32 %v710_v56, %v700_v8 }
 0x438   :  { %v723_v23 = vsel %vm1187_vm13, %v721_v2, 0.0 }
 0x439   :  { %v725_v25 = vadd.f32 %v723_v23, %v713_v59  ;;  %v718_v26 = vpop.xlane.xlu0 %717 }
 0x43a   :  { %v722_v13 = vsel %vm1187_vm13, %v718_v26, 0.0 }
 0x43b   :  { %919 = vrcp.f32 %v725_v25  ;;  %v724_v27 = vadd.f32 %v722_v13, %v712_v24  ;;  %v741_v40 = vpop.permute.xlu1 %740 }
 0x43d   :  { %921 = vrcp.f32 %v724_v27  ;;  %v739_v31 = vpop.permute.xlu0 %738 }
 0x445   :  { %v920_v28 = vpop.eup %919 }
 0x446   :  { %v729_v29 = vmul.f32 %v920_v28, %v725_v25 }
 0x447   :  { %v922_v33 = vpop.eup %921 }
 0x448   :  { %v731_v18 = vsub.f32 2.0, %v729_v29  ;;  %v728_v35 = vmul.f32 %v922_v33, %v724_v27 }
 0x44a   :  { %v733_v36 = vmul.f32 %v920_v28, %v731_v18  ;;  %v730_v37 = vsub.f32 2.0, %v728_v35 }
 0x44c   :  { %v732_v38 = vmul.f32 %v922_v33, %v730_v37  ;;  %v735_v39 = vmul.f32 %v1273_v16, %v733_v36 }
 0x44e   :  { %v745_v6 = vsel %vm552_vm7, %v735_v39, %v741_v40  ;;  %v734_v32 = vmul.f32 %v1278_v19, %v732_v38 }
 0x44f   :  { %v748_v41 = vsel %vm746_vm6, %v745_v6, 0.0 }
 0x450   :  { %750 = vst [vmem:[#allocation2 + $0x8] sm:$0xff] %v748_v41  ;;  %v744_v34 = vsel %vm552_vm7, %v734_v32, %v739_v31 }
 0x451   :  { %v747_v42 = vsel %vm746_vm6, %v744_v34, 0.0 }
 0x452   :  { %749 = vst [vmem:[#allocation2] sm:$0xff] %v747_v42 }
 0x453   :  { %934 = shalt.err (!%p931_p4)
}
 0x454   :  { %s935_s10 = scalar_lea.hbm %s1374_s7, 256 }
 0x455   :  { %p936_p5 = scmp.ne.s32.totalorder %s1374_s7, %s935_s10  ;;  %p939_p6 = scmp.lt.u32.totalorder %s935_s10, %s1374_s7 }
 0x457   :  { %p941_p7 = pnand %p939_p6, %p936_p5 }
 0x459   :  { %944 = shalt.err (!%p941_p7)
}
 0x45a   :  { %s951_s13 = smov 128   ;;  %s952_s14 = smov 8  }
 0x45b   :  { %762 = dma.vmem_to_hbm [thread:$0]  %s757_s29, 256, %s1374_s7, [#allocation3], %s951_s13, %s951_s13, %s952_s14  }
 0x45c   :  { %945 = dma.done.wait [#allocation3], 256  }
 0x45d   :  { %946 = vsyncadd [#allocation3], 4294967040 }
 0x45e   :  { %766 = vsyncpa [#allocation3], 1 }

</bundles_post_ra>
